<compile_context>
chip_gen: v6e
topology: v6e:2x2x1
jax: 0.10.0
libtpu: 0.0.40
codegen_flags: <defaults>
</compile_context>

<pallas_src>
import jax
import jax.numpy as jnp
from jax.experimental import pallas as pl
from jax.experimental.pallas import tpu as pltpu

# ---------------- synthetic "config" (deterministic, in-script) ----------------
CORE_STATE_SIZE = 24
CORE_ORIGINAL_GOAL_SIZE = 4
HRL_GOAL_SIZE = 5
ACTION_SIZE = 4
NO_GOAL = False

N_REWARDS = 3
HIDDEN_LAYERS = [32, 32]                                    # Critic.__init__ `layers`

GOAL_WIDTH = HRL_GOAL_SIZE + 3                              # 8  (post-ibottleneck width)
STATE_SLICE_LO = 3
STATE_SLICE_HI = CORE_STATE_SIZE - CORE_ORIGINAL_GOAL_SIZE  # 20  (states[:, 3:-COGS])
STATE_SLICE_W = STATE_SLICE_HI - STATE_SLICE_LO             # 17
IN_FEATURES = GOAL_WIDTH + STATE_SLICE_W + ACTION_SIZE      # 29

LANE = 128
H1_PAD = LANE
H2_PAD = LANE
OUT_PAD = 8                 # N_REWARDS=3 rounded up; 16x less output HBM traffic than 128
MAX_TILE_B = 8192           # rows per tile cap (~3 MiB/tile double-buffered, VMEM-safe)


def _round_up(x, m):
    return (x + m - 1) // m * m


def _tensorcores_per_chip():
    """Trace-time heuristic: dual-TC chips get a 2-way batch split."""
    try:
        kind = jax.devices()[0].device_kind.lower()
    except Exception:
        return 1
    if "v7" in kind:
        return 2
    if ("v5e" in kind) or ("lite" in kind) or ("v6" in kind):
        return 1
    if ("v4" in kind) or ("v5p" in kind):
        return 2
    return 1


def _choose_tiling(B, n_tc):
    """Returns (tile_rows, padded_batch, grid_size)."""
    # Dual-TC chips: even, sublane-aligned 2-way split -> one grid step per core,
    # no HBM padding required.
    if n_tc >= 2 and B >= 128 and B % 16 == 0 and (B // 2) <= MAX_TILE_B:
        return B // 2, B, 2
    # Single-TC chips / small batches: one grid step covering the whole batch
    # (full-array blocks -> no (8,128) constraint, no padding, no pipeline overhead).
    if B <= MAX_TILE_B:
        return B, B, 1
    # Very large batches: stream fixed-size tiles; pad only the ragged tail.
    tb = MAX_TILE_B
    bp = _round_up(B, tb)
    return tb, bp, bp // tb


# ------------------------------- Pallas kernel ---------------------------------
def critic_mlp_kernel(g_ref, s_ref, a_ref,
                      w0g_ref, w0s_ref, w0a_ref,
                      w1_ref, b1_ref, w2_ref, o_ref):
    # layer_0 (bias=False): the concat is fused as a sum of three matmuls; the
    # states[:, 3:-COGS] slice is folded into zero rows of w0s.
    h0 = jnp.dot(g_ref[...], w0g_ref[...], preferred_element_type=jnp.float32)
    h0 += jnp.dot(s_ref[...], w0s_ref[...], preferred_element_type=jnp.float32)
    h0 += jnp.dot(a_ref[...], w0a_ref[...], preferred_element_type=jnp.float32)
    h0 = jnp.maximum(h0, 0.0)                                            # ReLU (VPU)
    h1 = jnp.dot(h0, w1_ref[...], preferred_element_type=jnp.float32)    # layer_2 (+bias)
    h1 = jnp.tanh(h1 + b1_ref[...])                                      # Tanh (EUP)
    # layer_4 (no bias): narrow (H2_PAD x 8) weight -> only 8 live output lanes stored.
    o_ref[...] = jnp.dot(h1, w2_ref[...], preferred_element_type=jnp.float32)


# --------------------------------- forward --------------------------------------
def critic_forward(goals, states, actions, padded_params):
    """Semantics of Critic.forward: ibottleneck -> slice -> concat -> 3-layer MLP."""
    # TODO(synk): `ibottleneck` is an externally supplied module in the original
    # code; modeled here as identity (goals already GOAL_WIDTH wide).
    assert goals.dtype == jnp.float32
    assert not NO_GOAL
    w0g, w0s, w0a, w1, b1, w2 = padded_params

    B = goals.shape[0]
    n_tc = _tensorcores_per_chip()
    tb, bp, grid_b = _choose_tiling(B, n_tc)

    def maybe_pad(x):
        x = x.astype(jnp.float32)
        if x.shape[0] == bp:
            return x                                   # common paths: no HBM pad op
        return jnp.pad(x, ((0, bp - x.shape[0]), (0, 0)))

    g = maybe_pad(goals)
    s = maybe_pad(states)
    a = maybe_pad(actions)

    def row_spec(width):        # streamed per batch tile
        return pl.BlockSpec((tb, width), lambda i: (i, 0))

    def resident_spec(shape):   # stays pinned in VMEM across the whole grid
        return pl.BlockSpec(shape, lambda i: (0, 0))

    in_cols = GOAL_WIDTH + CORE_STATE_SIZE + ACTION_SIZE
    cost = pl.CostEstimate(
        flops=2 * bp * (in_cols * H1_PAD + H1_PAD * H2_PAD + H2_PAD * OUT_PAD),
        transcendentals=bp * H2_PAD,
        bytes_accessed=4 * (bp * (in_cols + OUT_PAD)
                            + in_cols * H1_PAD + H1_PAD * H2_PAD
                            + H2_PAD + H2_PAD * OUT_PAD),
    )

    out = pl.pallas_call(
        critic_mlp_kernel,
        out_shape=jax.ShapeDtypeStruct((bp, OUT_PAD), jnp.float32),
        grid=(grid_b,),
        in_specs=[
            row_spec(GOAL_WIDTH), row_spec(CORE_STATE_SIZE), row_spec(ACTION_SIZE),
            resident_spec(w0g.shape), resident_spec(w0s.shape), resident_spec(w0a.shape),
            resident_spec(w1.shape), resident_spec(b1.shape), resident_spec(w2.shape),
        ],
        out_specs=pl.BlockSpec((tb, OUT_PAD), lambda i: (i, 0)),
        compiler_params=pltpu.CompilerParams(
            dimension_semantics=("parallel",)),     # lets dual-TC chips shard the batch
        cost_estimate=cost,
    )(g, s, a, w0g, w0s, w0a, w1, b1, w2)

    return out[:B, :N_REWARDS]


# ------------------------------ parameter setup ---------------------------------
def init_params(key):
    """Deterministic init mimicking the PyTorch module's init scheme."""
    h1, h2 = HIDDEN_LAYERS
    k0, k1, kb1, k2 = jax.random.split(key, 4)

    def rl_uniform(k, in_f, out_f):
        # rl_ibounds: b = 1/sqrt(weight.size(0)) == 1/sqrt(out_features) in torch.
        b = 1.0 / float(out_f) ** 0.5
        return jax.random.uniform(k, (in_f, out_f), jnp.float32, -b, b)

    w0 = rl_uniform(k0, IN_FEATURES, h1)                  # layer_0 (29->32), bias=False
    w1 = rl_uniform(k1, h1, h2)                           # layer_2 (32->32), bias=True
    bb = 1.0 / float(h1) ** 0.5                           # torch default bias bound 1/sqrt(fan_in)
    b1 = jax.random.uniform(kb1, (1, h2), jnp.float32, -bb, bb)
    w2 = jax.random.uniform(k2, (h2, N_REWARDS), jnp.float32, -0.003, 0.003)  # last layer
    return w0, w1, b1, w2


def pad_params(w0, w1, b1, w2):
    """One-time layout prep: split w0 per input, fold the states slice into zero
    rows, zero-pad hidden dims to the 128-lane width and the output to 8 lanes."""
    h1, h2 = HIDDEN_LAYERS
    w0g = w0[:GOAL_WIDTH]
    w0s = w0[GOAL_WIDTH:GOAL_WIDTH + STATE_SLICE_W]
    w0a = w0[GOAL_WIDTH + STATE_SLICE_W:]

    w0g_p = jnp.zeros((GOAL_WIDTH, H1_PAD), jnp.float32).at[:, :h1].set(w0g)
    w0s_p = jnp.zeros((CORE_STATE_SIZE, H1_PAD), jnp.float32).at[
        STATE_SLICE_LO:STATE_SLICE_HI, :h1].set(w0s)
    w0a_p = jnp.zeros((ACTION_SIZE, H1_PAD), jnp.float32).at[:, :h1].set(w0a)
    w1_p = jnp.zeros((H1_PAD, H2_PAD), jnp.float32).at[:h1, :h2].set(w1)
    b1_p = jnp.zeros((1, H2_PAD), jnp.float32).at[:, :h2].set(b1)
    w2_p = jnp.zeros((H2_PAD, OUT_PAD), jnp.float32).at[:h2, :N_REWARDS].set(w2)
    return w0g_p, w0s_p, w0a_p, w1_p, b1_p, w2_p


# ------------------------------ pure-JAX reference -------------------------------
def critic_reference(goals, states, actions, params):
    w0, w1, b1, w2 = params
    hp = jax.lax.Precision.HIGHEST
    x = jnp.concatenate(
        [goals, states[:, STATE_SLICE_LO:STATE_SLICE_HI], actions], axis=1)
    h0 = jnp.maximum(jnp.dot(x, w0, precision=hp), 0.0)
    h1 = jnp.tanh(jnp.dot(h0, w1, precision=hp) + b1)
    return jnp.dot(h1, w2, precision=hp)


# ----------------------------------- main ----------------------------------------
if __name__ == "__main__":
    key = jax.random.PRNGKey(0)
    kp, kg, ks, ka = jax.random.split(key, 4)

    params = init_params(kp)
    padded = pad_params(*params)
    fwd = jax.jit(critic_forward)

    # Small batch (single-tile path, full-array blocks, no padding).
    B = 2
    goals = jax.random.normal(kg, (B, GOAL_WIDTH), jnp.float32)
    states = jax.random.normal(ks, (B, CORE_STATE_SIZE), jnp.float32)
    actions = jax.random.normal(ka, (B, ACTION_SIZE), jnp.float32)
    out = jax.block_until_ready(fwd(goals, states, actions, padded))
    assert out.shape == (B, N_REWARDS) and out.dtype == jnp.float32
    ref = critic_reference(goals, states, actions, params)
    assert jnp.allclose(out, ref, atol=2e-3, rtol=2e-3)

    # Larger batch: 1 grid step on single-TC chips, 2-way split on dual-TC chips.
    B2 = 2048
    kg2, ks2, ka2 = jax.random.split(jax.random.PRNGKey(1), 3)
    goals2 = jax.random.normal(kg2, (B2, GOAL_WIDTH), jnp.float32)
    states2 = jax.random.normal(ks2, (B2, CORE_STATE_SIZE), jnp.float32)
    actions2 = jax.random.normal(ka2, (B2, ACTION_SIZE), jnp.float32)
    out2 = jax.block_until_ready(fwd(goals2, states2, actions2, padded))
    assert out2.shape == (B2, N_REWARDS)
    ref2 = critic_reference(goals2, states2, actions2, params)
    assert jnp.allclose(out2, ref2, atol=2e-3, rtol=2e-3)

    print("KERNEL_OK")
</pallas_src>

<mosaic_0001>
module attributes {stable_mosaic.version = 11 : i64} {
  func.func @critic_mlp_kernel(%arg0: i32, %arg1: memref<2x8xf32, #tpu.memory_space<vmem>>, %arg2: memref<2x24xf32, #tpu.memory_space<vmem>>, %arg3: memref<2x4xf32, #tpu.memory_space<vmem>>, %arg4: memref<8x128xf32, #tpu.memory_space<vmem>>, %arg5: memref<24x128xf32, #tpu.memory_space<vmem>>, %arg6: memref<4x128xf32, #tpu.memory_space<vmem>>, %arg7: memref<128x128xf32, #tpu.memory_space<vmem>>, %arg8: memref<1x128xf32, #tpu.memory_space<vmem>>, %arg9: memref<128x8xf32, #tpu.memory_space<vmem>>, %arg10: memref<2x8xf32, #tpu.memory_space<vmem>>) attributes {dimension_semantics = [#tpu.dimension_semantics<parallel>], iteration_bounds = array<i64: 1>, scalar_prefetch = 0 : i64, scratch_operands = 0 : i64, tpu.core_type = #tpu.core_type<tc>, window_params = [{transform_indices = @transform_0, window_bounds = array<i64: 2, 8>}, {transform_indices = @transform_1, window_bounds = array<i64: 2, 24>}, {transform_indices = @transform_2, window_bounds = array<i64: 2, 4>}, {pipeline_mode = #tpu.pipeline_mode<synchronous>, transform_indices = @transform_3, window_bounds = array<i64: 8, 128>}, {pipeline_mode = #tpu.pipeline_mode<synchronous>, transform_indices = @transform_4, window_bounds = array<i64: 24, 128>}, {pipeline_mode = #tpu.pipeline_mode<synchronous>, transform_indices = @transform_5, window_bounds = array<i64: 4, 128>}, {pipeline_mode = #tpu.pipeline_mode<synchronous>, transform_indices = @transform_6, window_bounds = array<i64: 128, 128>}, {pipeline_mode = #tpu.pipeline_mode<synchronous>, transform_indices = @transform_7, window_bounds = array<i64: 1, 128>}, {pipeline_mode = #tpu.pipeline_mode<synchronous>, transform_indices = @transform_8, window_bounds = array<i64: 128, 8>}, {transform_indices = @transform_9, window_bounds = array<i64: 2, 8>}]} {
    %c0 = arith.constant 0 : index
    %c0_0 = arith.constant 0 : index
    %0 = vector.load %arg1[%c0, %c0_0] : memref<2x8xf32, #tpu.memory_space<vmem>>, vector<2x8xf32>
    %c0_1 = arith.constant 0 : index
    %c0_2 = arith.constant 0 : index
    %1 = vector.load %arg4[%c0_1, %c0_2] : memref<8x128xf32, #tpu.memory_space<vmem>>, vector<8x128xf32>
    %cst = arith.constant dense<0.000000e+00> : vector<2x128xf32>
    %2 = tpu.matmul %0, %1, %cst {dimension_numbers = #tpu.dot_dimension_numbers<[1], [0], [0], [1], [0, 0, 1, 1], [], []>} : vector<2x8xf32>, vector<8x128xf32>, vector<2x128xf32> -> vector<2x128xf32>
    %c0_3 = arith.constant 0 : index
    %c0_4 = arith.constant 0 : index
    %3 = vector.load %arg2[%c0_3, %c0_4] : memref<2x24xf32, #tpu.memory_space<vmem>>, vector<2x24xf32>
    %c0_5 = arith.constant 0 : index
    %c0_6 = arith.constant 0 : index
    %4 = vector.load %arg5[%c0_5, %c0_6] : memref<24x128xf32, #tpu.memory_space<vmem>>, vector<24x128xf32>
    %cst_7 = arith.constant dense<0.000000e+00> : vector<2x128xf32>
    %5 = tpu.matmul %3, %4, %cst_7 {dimension_numbers = #tpu.dot_dimension_numbers<[1], [0], [0], [1], [0, 0, 1, 1], [], []>} : vector<2x24xf32>, vector<24x128xf32>, vector<2x128xf32> -> vector<2x128xf32>
    %6 = arith.addf %2, %5 : vector<2x128xf32>
    %c0_8 = arith.constant 0 : index
    %c0_9 = arith.constant 0 : index
    %7 = vector.load %arg3[%c0_8, %c0_9] : memref<2x4xf32, #tpu.memory_space<vmem>>, vector<2x4xf32>
    %c0_10 = arith.constant 0 : index
    %c0_11 = arith.constant 0 : index
    %8 = vector.load %arg6[%c0_10, %c0_11] : memref<4x128xf32, #tpu.memory_space<vmem>>, vector<4x128xf32>
    %cst_12 = arith.constant dense<0.000000e+00> : vector<2x128xf32>
    %9 = tpu.matmul %7, %8, %cst_12 {dimension_numbers = #tpu.dot_dimension_numbers<[1], [0], [0], [1], [0, 0, 1, 1], [], []>} : vector<2x4xf32>, vector<4x128xf32>, vector<2x128xf32> -> vector<2x128xf32>
    %10 = arith.addf %6, %9 : vector<2x128xf32>
    %cst_13 = arith.constant 0.000000e+00 : f32
    %11 = vector.broadcast %cst_13 : f32 to vector<2x128xf32>
    %12 = arith.maximumf %10, %11 : vector<2x128xf32>
    %c0_14 = arith.constant 0 : index
    %c0_15 = arith.constant 0 : index
    %13 = vector.load %arg7[%c0_14, %c0_15] : memref<128x128xf32, #tpu.memory_space<vmem>>, vector<128x128xf32>
    %cst_16 = arith.constant dense<0.000000e+00> : vector<2x128xf32>
    %14 = tpu.matmul %12, %13, %cst_16 {dimension_numbers = #tpu.dot_dimension_numbers<[1], [0], [0], [1], [0, 0, 1, 1], [], []>} : vector<2x128xf32>, vector<128x128xf32>, vector<2x128xf32> -> vector<2x128xf32>
    %c0_17 = arith.constant 0 : index
    %c0_18 = arith.constant 0 : index
    %15 = vector.load %arg8[%c0_17, %c0_18] : memref<1x128xf32, #tpu.memory_space<vmem>>, vector<1x128xf32>
    %16 = vector.broadcast %15 : vector<1x128xf32> to vector<2x128xf32>
    %17 = arith.addf %14, %16 : vector<2x128xf32>
    %18 = math.tanh %17 : vector<2x128xf32>
    %c0_19 = arith.constant 0 : index
    %c0_20 = arith.constant 0 : index
    %19 = vector.load %arg9[%c0_19, %c0_20] : memref<128x8xf32, #tpu.memory_space<vmem>>, vector<128x8xf32>
    %cst_21 = arith.constant dense<0.000000e+00> : vector<2x8xf32>
    %20 = tpu.matmul %18, %19, %cst_21 {dimension_numbers = #tpu.dot_dimension_numbers<[1], [0], [0], [1], [0, 0, 1, 1], [], []>} : vector<2x128xf32>, vector<128x8xf32>, vector<2x8xf32> -> vector<2x8xf32>
    %c0_22 = arith.constant 0 : index
    %c0_23 = arith.constant 0 : index
    %21 = vector.load %arg10[%c0_22, %c0_23] : memref<2x8xf32, #tpu.memory_space<vmem>>, vector<2x8xf32>
    tpu.vector_store %arg10[%c0_22, %c0_23], %20 {strides = array<i32>} : memref<2x8xf32, #tpu.memory_space<vmem>>, vector<2x8xf32>,
    return
  }
  func.func @transform_0(%arg0: i32) -> (i32, i32) {
    %c0_i32 = arith.constant 0 : i32
    %c0_i32_0 = arith.constant 0 : i32
    return %arg0, %c0_i32 : i32, i32
  }
  func.func @transform_1(%arg0: i32) -> (i32, i32) {
    %c0_i32 = arith.constant 0 : i32
    %c0_i32_0 = arith.constant 0 : i32
    return %arg0, %c0_i32 : i32, i32
  }
  func.func @transform_2(%arg0: i32) -> (i32, i32) {
    %c0_i32 = arith.constant 0 : i32
    %c0_i32_0 = arith.constant 0 : i32
    return %arg0, %c0_i32 : i32, i32
  }
  func.func @transform_3(%arg0: i32) -> (i32, i32) {
    %c0_i32 = arith.constant 0 : i32
    %c0_i32_0 = arith.constant 0 : i32
    %c0_i32_1 = arith.constant 0 : i32
    return %c0_i32, %c0_i32_0 : i32, i32
  }
  func.func @transform_4(%arg0: i32) -> (i32, i32) {
    %c0_i32 = arith.constant 0 : i32
    %c0_i32_0 = arith.constant 0 : i32
    %c0_i32_1 = arith.constant 0 : i32
    return %c0_i32, %c0_i32_0 : i32, i32
  }
  func.func @transform_5(%arg0: i32) -> (i32, i32) {
    %c0_i32 = arith.constant 0 : i32
    %c0_i32_0 = arith.constant 0 : i32
    %c0_i32_1 = arith.constant 0 : i32
    return %c0_i32, %c0_i32_0 : i32, i32
  }
  func.func @transform_6(%arg0: i32) -> (i32, i32) {
    %c0_i32 = arith.constant 0 : i32
    %c0_i32_0 = arith.constant 0 : i32
    %c0_i32_1 = arith.constant 0 : i32
    return %c0_i32, %c0_i32_0 : i32, i32
  }
  func.func @transform_7(%arg0: i32) -> (i32, i32) {
    %c0_i32 = arith.constant 0 : i32
    %c0_i32_0 = arith.constant 0 : i32
    %c0_i32_1 = arith.constant 0 : i32
    return %c0_i32, %c0_i32_0 : i32, i32
  }
  func.func @transform_8(%arg0: i32) -> (i32, i32) {
    %c0_i32 = arith.constant 0 : i32
    %c0_i32_0 = arith.constant 0 : i32
    %c0_i32_1 = arith.constant 0 : i32
    return %c0_i32, %c0_i32_0 : i32, i32
  }
  func.func @transform_9(%arg0: i32) -> (i32, i32) {
    %c0_i32 = arith.constant 0 : i32
    %c0_i32_0 = arith.constant 0 : i32
    return %arg0, %c0_i32 : i32, i32
  }
}

</mosaic_0001>

<bundles_post_ra>
// kernel: critic_forward.1
= control target key start
LH: loop header
LB: loop body
LE: loop exit
PB: predicated region body
PF: predicated region fallthrough
CT: control target
= control target key end

     0   :  { %14 = vsyncpa [#allocation3], 0  ;;  %s998_s0 = inlined_call_operand.vmem [shape: f32[2,8], index: 0, kind: input, shape index: {}]   ;;  %s999_s1 = inlined_call_operand.hbm [shape: f32[2,24], index: 1, kind: input, shape index: {}]   ;;  %s1000_s2 = inlined_call_operand.hbm [shape: f32[2,4], index: 2, kind: input, shape index: {}]   ;;  %s1001_s3 = inlined_call_operand.vmem [shape: f32[8,128], index: 3, kind: input, shape index: {}]   ;;  %s1002_s4 = inlined_call_operand.hbm [shape: f32[24,128], index: 4, kind: input, shape index: {}]   ;;  %s1003_s5 = inlined_call_operand.vmem [shape: f32[4,128], index: 5, kind: input, shape index: {}]   ;;  %s1004_s6 = inlined_call_operand.vmem [shape: f32[128,128], index: 6, kind: input, shape index: {}]   ;;  %s1005_s7 = inlined_call_operand.hbm [shape: f32[1,128], index: 7, kind: input, shape index: {}]   ;;  %s1006_s8 = inlined_call_operand.vmem [shape: f32[128,8], index: 8, kind: input, shape index: {}]   ;;  %s1007_s9 = inlined_call_operand.hbm [shape: f32[2,8], index: 9, kind: output, shape index: {}]  }
   0x1   :  { %15 = vsyncpa [#allocation6], 0 }
   0x2   :  { %16 = vsyncpa [#allocation9], 0 }
   0x3   :  { %17 = vsyncpa [#allocation4], 0  ;;  %s772_s30 = smov [#allocation5]   ;;  %s773_s11 = smov [#allocation2]  }
   0x4   :  { %s36_s10 = sshll.u32 %s772_s30, 4  ;;  %s26_s12 = sshll.u32 %s773_s11, 4  ;;  %s37_s10 = int_to_ptr.vmem [resolvable:$true] %s36_s10  ;;  %s27_s12 = int_to_ptr.vmem [resolvable:$true] %s26_s12 }
   0x5   :  { %s672_s13 = scalar_lea.vmem %s37_s10, 32  ;;  %p677_p1 = scmp.lt.s32.totalorder %s37_s10, %s37_s10 }
   0x6   :  { %p673_p0 = scmp.ne.s32.totalorder %s37_s10, %s672_s13  ;;  %p678_p2 = scmp.lt.s32.totalorder %s672_s13, %s672_s13 }
   0x8   :  { %p679_p3 = por %p678_p2, %p677_p1 }
   0xa   :  { %p680_p4 = pnand %p679_p3, %p673_p0 }
   0xc   :  { %683 = shalt.err (!%p680_p4)
}
   0xd   :  { %39 = dma.hbm_to_vmem [thread:$0]  %s1000_s2, 32, %s37_s10, [#allocation6]  }
   0xe   :  { %s692_s16 = scalar_lea.vmem %s27_s12, 32  ;;  %p697_p6 = scmp.lt.s32.totalorder %s27_s12, %s27_s12 }
   0xf   :  { %p693_p5 = scmp.ne.s32.totalorder %s27_s12, %s692_s16  ;;  %p698_p7 = scmp.lt.s32.totalorder %s692_s16, %s692_s16 }
  0x11   :  { %p699_p8 = por %p698_p7, %p697_p6 }
  0x13   :  { %p700_p9 = pnand %p699_p8, %p693_p5 }
  0x15   :  { %703 = shalt.err (!%p700_p9)
}
  0x16   :  { %29 = dma.hbm_to_vmem [thread:$0]  %s999_s1, 32, %s27_s12, [#allocation3]  }
  0x17   :  { %s774_s19 = smov [#allocation7]  }
  0x18   :  { %s47_s20 = sshll.u32 %s774_s19, 4  ;;  %s48_s20 = int_to_ptr.vmem [resolvable:$true] %s47_s20 }
  0x19   :  { %s712_s21 = scalar_lea.vmem %s48_s20, 384  ;;  %p717_p11 = scmp.lt.s32.totalorder %s48_s20, %s48_s20 }
  0x1a   :  { %p713_p10 = scmp.ne.s32.totalorder %s48_s20, %s712_s21  ;;  %p718_p12 = scmp.lt.s32.totalorder %s712_s21, %s712_s21 }
  0x1c   :  { %p719_p13 = por %p718_p12, %p717_p11 }
  0x1e   :  { %p720_p0 = pnand %p719_p13, %p713_p10 }
  0x20   :  { %723 = shalt.err (!%p720_p0)
}
  0x21   :  { %s775_s2 = smov 128   ;;  %s776_s22 = smov 8  }
  0x22   :  { %53 = dma.hbm_to_vmem [thread:$0]  %s1002_s4, 384, %s48_s20, [#allocation6], %s775_s2, %s775_s2, %s776_s22  }
  0x23   :  { %s777_s25 = smov [#allocation8]  }
  0x24   :  { %s64_s26 = sshll.u32 %s777_s25, 4  ;;  %s65_s26 = int_to_ptr.vmem [resolvable:$true] %s64_s26 }
  0x25   :  { %s732_s1 = scalar_lea.vmem %s65_s26, 16  ;;  %s736_s27 = scalar_lea.vmem %s65_s26, 32 }
  0x26   :  { %p733_p1 = scmp.ne.s32.totalorder %s65_s26, %s732_s1  ;;  %p737_p2 = scmp.lt.s32.totalorder %s65_s26, %s65_s26 }
  0x27   :  { %p738_p3 = scmp.lt.s32.totalorder %s736_s27, %s732_s1 }
  0x29   :  { %p739_p4 = por %p738_p3, %p737_p2 }
  0x2b   :  { %p740_p5 = pnand %p739_p4, %p733_p1 }
  0x2d   :  { %743 = shalt.err (!%p740_p5)
}
  0x2e   :  { %67 = dma.hbm_to_vmem [thread:$0]  %s1005_s7, 16, %s65_s26, [#allocation9]  }
  0x2f   :  { %764 = dma.done.wait [#allocation3], 32  }
  0x30   :  { %765 = vsyncadd [#allocation3], 4294967264 }
  0x31   :  { %766 = dma.done.wait [#allocation6], 416  }
  0x32   :  { %767 = vsyncadd [#allocation6], 4294966880 }
  0x33   :  { %768 = dma.done.wait [#allocation9], 16  }
  0x34   :  { %769 = vsyncadd [#allocation9], 4294967280  ;;  %v778_v0 = vmov 0.0   ;;  %vm779_vm0 = vmmov 0   ;;  %vm162_vm1 = vcmask 64512   ;;  %v87_v1 = vld [vmem:[#allocation7 + $0x10] sm:$0xff] }
  0x35   :  { %564 = vmatprep.subr.mxu0 %v778_v0  ;;  %573 = vmatprep.subr.mxu1 %v778_v0  ;;  %v83_v2 = vld [vmem:[%s1001_s3] sm:$0xff]  ;;  %v86_v4 = vld [vmem:[#allocation7 + $0x8] sm:$0xff]  ;;  %vm242_vm2 = vcmask 1043456   ;;  %vm88_vm3 = vcmask 195584   ;;  %vm238_vm4 = vcmask 31744   ;;  %v333_v9 = vld [vmem:[%s1004_s6 + $0x78] sm:$0xff] }
  0x36   :  { %575 = vmatprep.mubr.msk.f32.mxu1 %vm779_vm0, %v778_v0  ;;  %570 = vmatprep.mubr.msk.f32.mxu0 %vm779_vm0, %v778_v0  ;;  %v82_v3 = vld [vmem:[%s998_s0] sm:$0x3]  ;;  %v85_v6 = vld [vmem:[#allocation7] sm:$0xff]  ;;  %v236_v8 = vld [vmem:[#allocation5] sm:$0x3]  ;;  %s780_s17 = smov [#allocation10]  }
  0x37   :  { %565 = vmatpush3.msra.mxu0 %v87_v1  ;;  %574 = vmatpush3.msra.mxu1 %v83_v2  ;;  %v237_v5 = vld [vmem:[%s1003_s5] sm:$0xf]  ;;  %v332_v10 = vld [vmem:[%s1004_s6 + $0x70] sm:$0xff]  ;;  %v331_v11 = vld [vmem:[%s1004_s6 + $0x68] sm:$0xff]  ;;  %s506_s18 = sshll.u32 %s780_s17, 4  ;;  %vm498_vm5 = vcmask 58368   ;;  %s507_s18 = int_to_ptr.vmem [resolvable:$true] %s506_s18 }
  0x38   :  { %566 = vmatprep.subr.mxu0 %v778_v0  ;;  %576 = vmatmul.mubr.msk.f32.vlgmr.msra.gmra.mxu1 %vm162_vm1, %v82_v3  ;;  %v84_v7 = vld [vmem:[#allocation2] sm:$0x3]  ;;  %v329_v13 = vld [vmem:[%s1004_s6 + $0x58] sm:$0xff]  ;;  %v328_v14 = vld [vmem:[%s1004_s6 + $0x50] sm:$0xff]  ;;  %s744_s19 = scalar_lea.vmem %s507_s18, 32  ;;  %p749_p7 = scmp.lt.s32.totalorder %s507_s18, %s507_s18 }
  0x39   :  { %567 = vmatpush3.msra.mxu0 %v86_v4  ;;  %578 = vmatprep.subr.mxu1 %v778_v0  ;;  %v330_v12 = vld [vmem:[%s1004_s6 + $0x60] sm:$0xff]  ;;  %v327_v15 = vld [vmem:[%s1004_s6 + $0x48] sm:$0xff]  ;;  %v325_v17 = vld [vmem:[%s1004_s6 + $0x38] sm:$0xff]  ;;  %p745_p6 = scmp.ne.s32.totalorder %s507_s18, %s744_s19  ;;  %p750_p8 = scmp.lt.s32.totalorder %s744_s19, %s744_s19 }
  0x3a   :  { %568 = vmatprep.subr.mxu0 %v778_v0  ;;  %579 = vmatpush3.msk.msra.mxu1 %vm242_vm2, %v237_v5  ;;  %v326_v16 = vld [vmem:[%s1004_s6 + $0x40] sm:$0xff]  ;;  %v324_v18 = vld [vmem:[%s1004_s6 + $0x30] sm:$0xff]  ;;  %v323_v19 = vld [vmem:[%s1004_s6 + $0x28] sm:$0xff] }
  0x3b   :  { %569 = vmatpush3.msra.mxu0 %v85_v6  ;;  %580 = vmatprep.mubr.msk.f32.mxu1 %vm779_vm0, %v778_v0  ;;  %v322_v20 = vld [vmem:[%s1004_s6 + $0x20] sm:$0xff]  ;;  %v321_v21 = vld [vmem:[%s1004_s6 + $0x18] sm:$0xff]  ;;  %v320_v22 = vld [vmem:[%s1004_s6 + $0x10] sm:$0xff]  ;;  %p751_p9 = por %p750_p8, %p749_p7 }
  0x3c   :  { %571 = vmatmul.mubr.msk.f32.vlgmr.msra.gmra.mxu0 %vm88_vm3, %v84_v7  ;;  %581 = vmatmul.mubr.msk.f32.vlgmr.msra.gmra.mxu1 %vm238_vm4, %v236_v8  ;;  %v319_v23 = vld [vmem:[%s1004_s6 + $0x8] sm:$0xff]  ;;  %v318_v24 = vld [vmem:[%s1004_s6] sm:$0xff]  ;;  %v427_v25 = vld [vmem:[%s1006_s8 + $0x78] sm:$0xff] }
  0x3d   :  { %583 = vmatprep.subr.mxu0 %v778_v0  ;;  %615 = vmatprep.mubr.msk.f32.mxu0 %vm779_vm0, %v778_v0  ;;  %v426_v26 = vld [vmem:[%s1006_s8 + $0x70] sm:$0xff]  ;;  %v425_v27 = vld [vmem:[%s1006_s8 + $0x68] sm:$0xff]  ;;  %v424_v28 = vld [vmem:[%s1006_s8 + $0x60] sm:$0xff]  ;;  %p752_p10 = pnand %p751_p9, %p745_p6 }
  0x3e   :  { %584 = vmatpush3.msra.mxu0 %v333_v9  ;;  %618 = vmatprep.subr.mxu1 %v778_v0  ;;  %v423_v29 = vld [vmem:[%s1006_s8 + $0x58] sm:$0xff]  ;;  %v422_v30 = vld [vmem:[%s1006_s8 + $0x50] sm:$0xff]  ;;  %v421_v31 = vld [vmem:[%s1006_s8 + $0x48] sm:$0xff] }
  0x3f   :  { %585 = vmatprep.subr.mxu0 %v778_v0  ;;  %650 = vmatprep.mubr.msk.f32.mxu1 %vm779_vm0, %v778_v0  ;;  %v420_v41 = vld [vmem:[%s1006_s8 + $0x40] sm:$0xff]  ;;  %v419_v42 = vld [vmem:[%s1006_s8 + $0x38] sm:$0xff]  ;;  %v418_v43 = vld [vmem:[%s1006_s8 + $0x30] sm:$0xff] }
  0x40   :  { %586 = vmatpush3.msra.mxu0 %v332_v10  ;;  %619 = vmatpush3.msra.mxu1 %v427_v25  ;;  %v417_v44 = vld [vmem:[%s1006_s8 + $0x28] sm:$0xff]  ;;  %v416_v45 = vld [vmem:[%s1006_s8 + $0x20] sm:$0xff]  ;;  %v415_v46 = vld [vmem:[%s1006_s8 + $0x18] sm:$0xff] }
  0x41   :  { %587 = vmatprep.subr.mxu0 %v778_v0  ;;  %620 = vmatprep.subr.mxu1 %v778_v0  ;;  %v414_v47 = vld [vmem:[%s1006_s8 + $0x10] sm:$0xff]  ;;  %v413_v48 = vld [vmem:[%s1006_s8 + $0x8] sm:$0xff]  ;;  %v412_v49 = vld [vmem:[%s1006_s8] sm:$0xff] }
  0x42   :  { %588 = vmatpush3.msra.mxu0 %v331_v11  ;;  %621 = vmatpush3.msra.mxu1 %v426_v26  ;;  %v521_v50 = vld [vmem:[#allocation8] ss:$0 sm:$0xff] }
  0x43   :  { %589 = vmatprep.subr.mxu0 %v778_v0  ;;  %622 = vmatprep.subr.mxu1 %v778_v0 }
  0x44   :  { %590 = vmatpush3.msra.mxu0 %v330_v12  ;;  %623 = vmatpush3.msra.mxu1 %v425_v27 }
  0x45   :  { %591 = vmatprep.subr.mxu0 %v778_v0  ;;  %624 = vmatprep.subr.mxu1 %v778_v0 }
  0x46   :  { %592 = vmatpush3.msra.mxu0 %v329_v13  ;;  %625 = vmatpush3.msra.mxu1 %v424_v28 }
  0x47   :  { %593 = vmatprep.subr.mxu0 %v778_v0  ;;  %626 = vmatprep.subr.mxu1 %v778_v0 }
  0x48   :  { %594 = vmatpush3.msra.mxu0 %v328_v14  ;;  %627 = vmatpush3.msra.mxu1 %v423_v29 }
  0x49   :  { %595 = vmatprep.subr.mxu0 %v778_v0  ;;  %628 = vmatprep.subr.mxu1 %v778_v0 }
  0x4a   :  { %596 = vmatpush3.msra.mxu0 %v327_v15  ;;  %629 = vmatpush3.msra.mxu1 %v422_v30 }
  0x4b   :  { %597 = vmatprep.subr.mxu0 %v778_v0  ;;  %630 = vmatprep.subr.mxu1 %v778_v0 }
  0x4c   :  { %598 = vmatpush3.msra.mxu0 %v326_v16  ;;  %631 = vmatpush3.msra.mxu1 %v421_v31 }
  0x4d   :  { %599 = vmatprep.subr.mxu0 %v778_v0  ;;  %632 = vmatprep.subr.mxu1 %v778_v0 }
  0x4e   :  { %600 = vmatpush3.msra.mxu0 %v325_v17  ;;  %633 = vmatpush3.msra.mxu1 %v420_v41 }
  0x4f   :  { %601 = vmatprep.subr.mxu0 %v778_v0  ;;  %634 = vmatprep.subr.mxu1 %v778_v0 }
  0x50   :  { %602 = vmatpush3.msra.mxu0 %v324_v18  ;;  %635 = vmatpush3.msra.mxu1 %v419_v42 }
  0x51   :  { %603 = vmatprep.subr.mxu0 %v778_v0  ;;  %636 = vmatprep.subr.mxu1 %v778_v0 }
  0x52   :  { %604 = vmatpush3.msra.mxu0 %v323_v19  ;;  %637 = vmatpush3.msra.mxu1 %v418_v43 }
  0x53   :  { %605 = vmatprep.subr.mxu0 %v778_v0  ;;  %638 = vmatprep.subr.mxu1 %v778_v0 }
  0x54   :  { %606 = vmatpush3.msra.mxu0 %v322_v20  ;;  %639 = vmatpush3.msra.mxu1 %v417_v44 }
  0x55   :  { %607 = vmatprep.subr.mxu0 %v778_v0  ;;  %640 = vmatprep.subr.mxu1 %v778_v0 }
  0x56   :  { %608 = vmatpush3.msra.mxu0 %v321_v21  ;;  %641 = vmatpush3.msra.mxu1 %v416_v45 }
  0x57   :  { %609 = vmatprep.subr.mxu0 %v778_v0  ;;  %642 = vmatprep.subr.mxu1 %v778_v0 }
  0x58   :  { %610 = vmatpush3.msra.mxu0 %v320_v22  ;;  %643 = vmatpush3.msra.mxu1 %v415_v46 }
  0x59   :  { %611 = vmatprep.subr.mxu0 %v778_v0  ;;  %644 = vmatprep.subr.mxu1 %v778_v0 }
  0x5a   :  { %612 = vmatpush3.msra.mxu0 %v319_v23  ;;  %645 = vmatpush3.msra.mxu1 %v414_v47 }
  0x5b   :  { %613 = vmatprep.subr.mxu0 %v778_v0  ;;  %646 = vmatprep.subr.mxu1 %v778_v0 }
  0x5c   :  { %614 = vmatpush3.msra.mxu0 %v318_v24  ;;  %647 = vmatpush3.msra.mxu1 %v413_v48 }
  0x5d   :  { %648 = vmatprep.subr.mxu1 %v778_v0 }
  0x5e   :  { %649 = vmatpush3.msra.mxu1 %v412_v49 }
  0xf8   :  { %v232_v32 = vpop.f32.mrf.mxu1 }
  0xfa   :  { %v577_v33 = vpop.f32.mrf.mxu1 }
  0xfc   :  { %v158_v34 = vpop.f32.mrf.mxu0  ;;  %v312_v35 = vpop.f32.mrf.mxu1 }
  0xfd   :  { %v233_v36 = vadd.f32 %v232_v32, %v158_v34 }
  0xfe   :  { %v572_v37 = vpop.f32.mrf.mxu0  ;;  %v582_v38 = vpop.f32.mrf.mxu1 }
  0xff   :  { %v316_v39 = vadd.f32 %v312_v35, %v233_v36 }
 0x101   :  { %v317_v40 = vmax.f32 %v316_v39, 0.0 }
 0x103   :  { %616 = vmatmul.mubr.f32.vlgmr.msra.gmra.mxu0 %v317_v40 }
 0x1c3   :  { %v407_v51 = vpop.f32.mrf.mxu0 }
 0x1c4   :  { %v408_v52 = vadd.f32 %v521_v50, %v407_v51 }
 0x1c5   :  { %v617_v53 = vpop.f32.mrf.mxu0 }
 0x1c6   :  { %662 = vtanh.f32 %v408_v52 }
 0x1d3   :  { %v663_v54 = vpop.eup %662 }
 0x1d4   :  { %651 = vmatmul.mubr.f32.vlgmr.msra.gmra.mxu1 %v663_v54 }
 0x294   :  { %v494_v55 = vpop.f32.mrf.mxu1 }
 0x295   :  { %499 = vst.msk [vmem:[#allocation10] sm:$0x3] %vm498_vm5, %v494_v55 }
 0x296   :  { %v652_v56 = vpop.f32.mrf.mxu1 }
 0x297   :  { %755 = shalt.err (!%p752_p10)
}
 0x298   :  { %509 = dma.vmem_to_hbm [thread:$0]  %s507_s18, 32, %s1007_s9, [#allocation4]  }
 0x299   :  { %770 = dma.done.wait [#allocation4], 32  }
 0x29a   :  { %771 = vsyncadd [#allocation4], 4294967264 }
 0x29b   :  { %513 = vsyncpa [#allocation3], 1 }
 0x29c   :  { %514 = vsyncpa [#allocation6], 1 }
 0x29d   :  { %515 = vsyncpa [#allocation9], 1 }
 0x29e   :  { %516 = vsyncpa [#allocation4], 1 }

</bundles_post_ra>
